<compile_context>
chip_gen: v7x
topology: tpu7x:2x2x1
jax: 0.10.0
libtpu: 0.0.40
codegen_flags: <defaults>
</compile_context>

<pallas_src>
import functools

import jax
import jax.numpy as jnp
from jax.experimental import pallas as pl
from jax.experimental.pallas import tpu as pltpu


def _round_up(x, m):
    return ((x + m - 1) // m) * m


def _cdiv(a, b):
    return (a + b - 1) // b


def _num_tensorcores_per_chip():
    """Best-effort count of TensorCores sharing a chip (megacore sharding)."""
    try:
        kind = jax.devices()[0].device_kind.lower()
    except Exception:
        return 1
    if "v7" in kind or "v5p" in kind or "v4" in kind:
        return 2
    return 1


def _pick_tile(n, tile_cap, num_tc):
    """Pick (tile, n_pad, grid): big tiles, single step on 1-TC chips,
    even balanced grid with minimal padding on 2-TC chips."""
    tile_cap = max(128, _round_up(tile_cap, 128))
    n128 = _round_up(max(n, 1), 128)
    if num_tc <= 1 or n128 <= 128:
        tile = min(tile_cap, n128)
    else:
        # Smallest even grid (2k steps) whose tile fits under the cap.
        k = 1
        while _round_up(_cdiv(n, 2 * k), 128) > tile_cap:
            k += 1
        tile = _round_up(_cdiv(n, 2 * k), 128)
    tile = max(tile, 128)
    n_pad = _round_up(max(n, 1), tile)
    grid = n_pad // tile
    return tile, n_pad, grid


def _link_predictor_kernel(num_hidden, *refs):
    # refs = (xi_ref, xj_ref, w0, b0, ..., w_{L-1}, b_{L-1}, out_ref)
    xi_ref, xj_ref = refs[0], refs[1]
    out_ref = refs[-1]
    params = refs[2:-1]

    # Hadamard product of the node embeddings, widened to f32 explicitly
    # (v5e's VPU has no bf16 path; explicit widen beats implicit promotion).
    x = xi_ref[...].astype(jnp.float32) * xj_ref[...].astype(jnp.float32)  # (tile, in_ch)

    # Single transpose on the narrow (tile, in_ch) block. From here on every
    # activation is (features, tile): lane-dense since tile is a 128 multiple.
    x = x.T                                                                # (in_ch, tile)

    # Hidden layers: y = relu(W @ x + b), W in torch (out, in) orientation.
    # Dropout is identity in eval mode.
    for l in range(num_hidden):
        w = params[2 * l][...]          # (out_l, in_l)
        b = params[2 * l + 1][...]      # (out_l, 1) -- broadcasts over lanes
        x = jnp.dot(w, x, preferred_element_type=jnp.float32) + b
        x = jnp.maximum(x, 0.0)

    # Output layer + sigmoid; lane-dense (out_ch, tile) store.
    w_last = params[-2][...]            # (out_ch, hidden)
    b_last = params[-1][...]            # (out_ch, 1)
    s = jnp.dot(w_last, x, preferred_element_type=jnp.float32) + b_last
    out_ref[...] = jax.nn.sigmoid(s).astype(out_ref.dtype)


def link_predictor_forward(x_i, x_j, weights, biases, *,
                           tile_n=4096, input_dtype=jnp.bfloat16):
    """LinkPredictor forward (eval mode).

    x_i, x_j:   (N, in_channels)
    weights[l]: (out_features_l, in_features_l)   -- torch nn.Linear orientation
    biases[l]:  (out_features_l,)
    returns:    (N, out_channels) float32
    """
    num_layers = len(weights)
    N, in_ch = x_i.shape
    out_ch = weights[-1].shape[0]

    # Inputs dominate HBM traffic for this kernel: store them as bf16.
    if input_dtype is not None:
        x_i = x_i.astype(input_dtype)
        x_j = x_j.astype(input_dtype)

    num_tc = _num_tensorcores_per_chip()
    tile, n_pad, grid = _pick_tile(N, tile_n, num_tc)

    if n_pad != N:
        pad = n_pad - N
        x_i = jnp.pad(x_i, ((0, pad), (0, 0)))
        x_j = jnp.pad(x_j, ((0, pad), (0, 0)))

    kernel = functools.partial(_link_predictor_kernel, num_layers - 1)

    # Activations: tile over the batch dimension only (features are full-width).
    # TODO(synk): if the upstream producer can emit (in_ch, N) layout, feed it
    # pre-transposed with BlockSpec((in_ch, tile), lambda i: (0, i)) and drop
    # the in-kernel transpose entirely (an XLA-side transpose here would cost
    # an extra HBM pass and cancel the gain, so we do not do it in the wrapper).
    act_spec = pl.BlockSpec((tile, in_ch), lambda i: (i, 0))

    in_specs = [act_spec, act_spec]
    flat_args = [x_i, x_j]
    for w, b in zip(weights, biases):
        w2 = jnp.asarray(w, jnp.float32)
        b2 = jnp.asarray(b, jnp.float32).reshape(w2.shape[0], 1)
        in_specs.append(pl.BlockSpec(w2.shape, lambda i: (0, 0)))  # resident in VMEM
        in_specs.append(pl.BlockSpec(b2.shape, lambda i: (0, 0)))
        flat_args += [w2, b2]

    # Lane-dense output slab: (out_ch, n_pad), blocks of (out_ch, tile).
    out_specs = pl.BlockSpec((out_ch, tile), lambda i: (0, i))

    grid_spec = pltpu.PrefetchScalarGridSpec(
        num_scalar_prefetch=0,
        grid=(grid,),
        in_specs=in_specs,
        out_specs=out_specs,
    )

    out_t = pl.pallas_call(
        kernel,
        out_shape=jax.ShapeDtypeStruct((out_ch, n_pad), jnp.float32),
        grid_spec=grid_spec,
        compiler_params=pltpu.CompilerParams(
            dimension_semantics=("parallel",)),
    )(*flat_args)

    # (out_ch, n_pad) -> (N, out_ch): drop padded rows, transpose back.
    return out_t[:, :N].T


def _reference_forward(x_i, x_j, weights, biases):
    x = x_i * x_j
    for l in range(len(weights) - 1):
        x = jnp.maximum(jnp.dot(x, weights[l].T) + biases[l], 0.0)
    return jax.nn.sigmoid(jnp.dot(x, weights[-1].T) + biases[-1])


if __name__ == "__main__":
    # Module hyperparameters (consistent with LinkPredictor.__init__).
    in_channels = 32
    hidden_channels = 64
    out_channels = 1
    num_layers = 3
    dropout = 0.5  # identity at inference (F.dropout with training=False)

    # Small, non-128-divisible batch: exercises the padded cdiv grid and (on
    # dual-TensorCore chips) a balanced 2-step parallel grid.
    batch = 300

    key = jax.random.PRNGKey(0)
    k_xi, k_xj, k_p = jax.random.split(key, 3)
    x_i = jax.random.normal(k_xi, (batch, in_channels), dtype=jnp.float32)
    x_j = jax.random.normal(k_xj, (batch, in_channels), dtype=jnp.float32)

    # Deterministic parameter init (Kaiming-uniform-like bounds, as nn.Linear),
    # stored in torch orientation: W is (out_features, in_features).
    layer_dims = [(in_channels, hidden_channels)]
    layer_dims += [(hidden_channels, hidden_channels)] * (num_layers - 2)
    layer_dims += [(hidden_channels, out_channels)]

    weights, biases = [], []
    pkeys = jax.random.split(k_p, 2 * len(layer_dims))
    for l, (fan_in, fan_out) in enumerate(layer_dims):
        bound = 1.0 / (fan_in ** 0.5)
        w = jax.random.uniform(pkeys[2 * l], (fan_out, fan_in),
                               minval=-bound, maxval=bound, dtype=jnp.float32)
        b = jax.random.uniform(pkeys[2 * l + 1], (fan_out,),
                               minval=-bound, maxval=bound, dtype=jnp.float32)
        weights.append(w)
        biases.append(b)

    out = link_predictor_forward(x_i, x_j, weights, biases)
    out = jax.block_until_ready(out)

    # Reference computed on the same bf16-quantized inputs the wrapper stores
    # in HBM (f32 math thereafter), so the comparison isolates kernel bugs.
    xi_q = x_i.astype(jnp.bfloat16).astype(jnp.float32)
    xj_q = x_j.astype(jnp.bfloat16).astype(jnp.float32)
    ref = _reference_forward(xi_q, xj_q, weights, biases)

    assert out.shape == (batch, out_channels), out.shape
    max_err = float(jnp.max(jnp.abs(out - ref)))
    assert max_err < 2e-3, max_err

    print("KERNEL_OK")
</pallas_src>

<mosaic_0001>
module attributes {stable_mosaic.version = 11 : i64} {
  func.func @_link_predictor_kernel(%arg0: i32, %arg1: memref<384x32xbf16, #tpu.memory_space<vmem>>, %arg2: memref<384x32xbf16, #tpu.memory_space<vmem>>, %arg3: memref<64x32xf32, #tpu.memory_space<vmem>>, %arg4: memref<64x1xf32, #tpu.memory_space<vmem>>, %arg5: memref<64x64xf32, #tpu.memory_space<vmem>>, %arg6: memref<64x1xf32, #tpu.memory_space<vmem>>, %arg7: memref<1x64xf32, #tpu.memory_space<vmem>>, %arg8: memref<1x1xf32, #tpu.memory_space<vmem>>, %arg9: memref<1x384xf32, #tpu.memory_space<vmem>>) attributes {dimension_semantics = [#tpu.dimension_semantics<parallel>], iteration_bounds = array<i64: 1>, scalar_prefetch = 0 : i64, scratch_operands = 0 : i64, tpu.core_type = #tpu.core_type<tc>, window_params = [{transform_indices = @transform_0, window_bounds = array<i64: 384, 32>}, {transform_indices = @transform_1, window_bounds = array<i64: 384, 32>}, {pipeline_mode = #tpu.pipeline_mode<synchronous>, transform_indices = @transform_2, window_bounds = array<i64: 64, 32>}, {pipeline_mode = #tpu.pipeline_mode<synchronous>, transform_indices = @transform_3, window_bounds = array<i64: 64, 1>}, {pipeline_mode = #tpu.pipeline_mode<synchronous>, transform_indices = @transform_4, window_bounds = array<i64: 64, 64>}, {pipeline_mode = #tpu.pipeline_mode<synchronous>, transform_indices = @transform_5, window_bounds = array<i64: 64, 1>}, {pipeline_mode = #tpu.pipeline_mode<synchronous>, transform_indices = @transform_6, window_bounds = array<i64: 1, 64>}, {pipeline_mode = #tpu.pipeline_mode<synchronous>, transform_indices = @transform_7, window_bounds = array<i64: 1, 1>}, {transform_indices = @transform_8, window_bounds = array<i64: 1, 384>}]} {
    %c0 = arith.constant 0 : index
    %c0_0 = arith.constant 0 : index
    %0 = vector.load %arg1[%c0, %c0_0] : memref<384x32xbf16, #tpu.memory_space<vmem>>, vector<384x32xbf16>
    %1 = arith.extf %0 : vector<384x32xbf16> to vector<384x32xf32>
    %c0_1 = arith.constant 0 : index
    %c0_2 = arith.constant 0 : index
    %2 = vector.load %arg2[%c0_1, %c0_2] : memref<384x32xbf16, #tpu.memory_space<vmem>>, vector<384x32xbf16>
    %3 = arith.extf %2 : vector<384x32xbf16> to vector<384x32xf32>
    %4 = arith.mulf %1, %3 : vector<384x32xf32>
    %5 = tpu.transpose %4, [1, 0] : vector<384x32xf32> -> vector<32x384xf32>
    %c0_3 = arith.constant 0 : index
    %c0_4 = arith.constant 0 : index
    %6 = vector.load %arg3[%c0_3, %c0_4] : memref<64x32xf32, #tpu.memory_space<vmem>>, vector<64x32xf32>
    %c0_5 = arith.constant 0 : index
    %c0_6 = arith.constant 0 : index
    %7 = vector.load %arg4[%c0_5, %c0_6] : memref<64x1xf32, #tpu.memory_space<vmem>>, vector<64x1xf32>
    %cst = arith.constant dense<0.000000e+00> : vector<64x384xf32>
    %8 = tpu.matmul %6, %5, %cst {dimension_numbers = #tpu.dot_dimension_numbers<[1], [0], [0], [1], [0, 0, 1, 1], [], []>} : vector<64x32xf32>, vector<32x384xf32>, vector<64x384xf32> -> vector<64x384xf32>
    %9 = vector.broadcast %7 : vector<64x1xf32> to vector<64x384xf32>
    %10 = arith.addf %8, %9 : vector<64x384xf32>
    %cst_7 = arith.constant 0.000000e+00 : f32
    %11 = vector.broadcast %cst_7 : f32 to vector<64x384xf32>
    %12 = arith.maximumf %10, %11 : vector<64x384xf32>
    %c0_8 = arith.constant 0 : index
    %c0_9 = arith.constant 0 : index
    %13 = vector.load %arg5[%c0_8, %c0_9] : memref<64x64xf32, #tpu.memory_space<vmem>>, vector<64x64xf32>
    %c0_10 = arith.constant 0 : index
    %c0_11 = arith.constant 0 : index
    %14 = vector.load %arg6[%c0_10, %c0_11] : memref<64x1xf32, #tpu.memory_space<vmem>>, vector<64x1xf32>
    %cst_12 = arith.constant dense<0.000000e+00> : vector<64x384xf32>
    %15 = tpu.matmul %13, %12, %cst_12 {dimension_numbers = #tpu.dot_dimension_numbers<[1], [0], [0], [1], [0, 0, 1, 1], [], []>} : vector<64x64xf32>, vector<64x384xf32>, vector<64x384xf32> -> vector<64x384xf32>
    %16 = vector.broadcast %14 : vector<64x1xf32> to vector<64x384xf32>
    %17 = arith.addf %15, %16 : vector<64x384xf32>
    %cst_13 = arith.constant 0.000000e+00 : f32
    %18 = vector.broadcast %cst_13 : f32 to vector<64x384xf32>
    %19 = arith.maximumf %17, %18 : vector<64x384xf32>
    %c0_14 = arith.constant 0 : index
    %c0_15 = arith.constant 0 : index
    %20 = vector.load %arg7[%c0_14, %c0_15] : memref<1x64xf32, #tpu.memory_space<vmem>>, vector<1x64xf32>
    %c0_16 = arith.constant 0 : index
    %c0_17 = arith.constant 0 : index
    %21 = vector.load %arg8[%c0_16, %c0_17] : memref<1x1xf32, #tpu.memory_space<vmem>>, vector<1x1xf32>
    %cst_18 = arith.constant dense<0.000000e+00> : vector<1x384xf32>
    %22 = tpu.matmul %20, %19, %cst_18 {dimension_numbers = #tpu.dot_dimension_numbers<[1], [0], [0], [1], [0, 0, 1, 1], [], []>} : vector<1x64xf32>, vector<64x384xf32>, vector<1x384xf32> -> vector<1x384xf32>
    %23 = vector.broadcast %21 : vector<1x1xf32> to vector<1x384xf32>
    %24 = arith.addf %22, %23 : vector<1x384xf32>
    %25 = arith.negf %24 : vector<1x384xf32>
    %26 = math.exp %25 : vector<1x384xf32>
    %cst_19 = arith.constant 1.000000e+00 : f32
    %27 = vector.broadcast %cst_19 : f32 to vector<1x384xf32>
    %28 = arith.addf %27, %26 : vector<1x384xf32>
    %29 = arith.divf %27, %28 : vector<1x384xf32>
    %c0_20 = arith.constant 0 : index
    %c0_21 = arith.constant 0 : index
    %30 = vector.load %arg9[%c0_20, %c0_21] : memref<1x384xf32, #tpu.memory_space<vmem>>, vector<1x384xf32>
    tpu.vector_store %arg9[%c0_20, %c0_21], %29 {strides = array<i32>} : memref<1x384xf32, #tpu.memory_space<vmem>>, vector<1x384xf32>,
    return
  }
  func.func @transform_0(%arg0: i32) -> (i32, i32) {
    %c0_i32 = arith.constant 0 : i32
    %c0_i32_0 = arith.constant 0 : i32
    return %arg0, %c0_i32 : i32, i32
  }
  func.func @transform_1(%arg0: i32) -> (i32, i32) {
    %c0_i32 = arith.constant 0 : i32
    %c0_i32_0 = arith.constant 0 : i32
    return %arg0, %c0_i32 : i32, i32
  }
  func.func @transform_2(%arg0: i32) -> (i32, i32) {
    %c0_i32 = arith.constant 0 : i32
    %c0_i32_0 = arith.constant 0 : i32
    %c0_i32_1 = arith.constant 0 : i32
    return %c0_i32, %c0_i32_0 : i32, i32
  }
  func.func @transform_3(%arg0: i32) -> (i32, i32) {
    %c0_i32 = arith.constant 0 : i32
    %c0_i32_0 = arith.constant 0 : i32
    %c0_i32_1 = arith.constant 0 : i32
    return %c0_i32, %c0_i32_0 : i32, i32
  }
  func.func @transform_4(%arg0: i32) -> (i32, i32) {
    %c0_i32 = arith.constant 0 : i32
    %c0_i32_0 = arith.constant 0 : i32
    %c0_i32_1 = arith.constant 0 : i32
    return %c0_i32, %c0_i32_0 : i32, i32
  }
  func.func @transform_5(%arg0: i32) -> (i32, i32) {
    %c0_i32 = arith.constant 0 : i32
    %c0_i32_0 = arith.constant 0 : i32
    %c0_i32_1 = arith.constant 0 : i32
    return %c0_i32, %c0_i32_0 : i32, i32
  }
  func.func @transform_6(%arg0: i32) -> (i32, i32) {
    %c0_i32 = arith.constant 0 : i32
    %c0_i32_0 = arith.constant 0 : i32
    %c0_i32_1 = arith.constant 0 : i32
    return %c0_i32, %c0_i32_0 : i32, i32
  }
  func.func @transform_7(%arg0: i32) -> (i32, i32) {
    %c0_i32 = arith.constant 0 : i32
    %c0_i32_0 = arith.constant 0 : i32
    %c0_i32_1 = arith.constant 0 : i32
    return %c0_i32, %c0_i32_0 : i32, i32
  }
  func.func @transform_8(%arg0: i32) -> (i32, i32) {
    %c0_i32 = arith.constant 0 : i32
    %c0_i32_0 = arith.constant 0 : i32
    return %c0_i32, %arg0 : i32, i32
  }
}

</mosaic_0001>

<bundles_post_ra>
// kernel: tpu_custom_call.1
= control target key start
LH: loop header
LB: loop body
LE: loop exit
PB: predicated region body
PF: predicated region fallthrough
CT: control target
= control target key end

     0   :  { %s2474_s0 = inlined_call_operand.vmem [shape: bf16[384,32], index: 0, kind: input, shape index: {}]   ;;  %s2475_s1 = inlined_call_operand.vmem [shape: bf16[384,32], index: 1, kind: input, shape index: {}]   ;;  %s2476_s2 = inlined_call_operand.vmem [shape: f32[64,32], index: 2, kind: input, shape index: {}]   ;;  %s2477_s3 = inlined_call_operand.vmem [shape: f32[64,1], index: 3, kind: input, shape index: {}]   ;;  %s2478_s4 = inlined_call_operand.vmem [shape: f32[64,64], index: 4, kind: input, shape index: {}]   ;;  %s2479_s5 = inlined_call_operand.vmem [shape: f32[64,1], index: 5, kind: input, shape index: {}]   ;;  %s2480_s6 = inlined_call_operand.vmem [shape: f32[1,64], index: 6, kind: input, shape index: {}]   ;;  %s2481_s7 = inlined_call_operand.<no memory space> [shape: f32[1,1], index: 7, kind: input, shape index: {}]   ;;  %s2482_s8 = inlined_call_operand.hbm [shape: f32[1,384], index: 8, kind: output, shape index: {}]  }
   0x1   :  { %v13_v0 = vstv %s2481_s7 }
   0x2   :  { %14 = vst [vmem:[#allocation2] sm:$0x1] %v13_v0 }
   0x3   :  { %v1565_v1 = vld [vmem:[%s2474_s0 + $0x40] sm:$0xff]   ;;  %vm328_vm0 = vcmask 261120   ;;  %v1992_v10 = vmov 0   ;;  %v1566_v16 = vld [vmem:[%s2474_s0 + $0x48] sm:$0xff]   ;;  %v1567_v43 = vld [vmem:[%s2474_s0 + $0x50] sm:$0xff]  }
   0x4   :  { %v1588_v2 = vld [vmem:[%s2475_s1 + $0x40] sm:$0xff]   ;;  %v1400_v4 = vunpack.c.l.bf16 %v1565_v1  ;;  %v1401_v5 = vunpack.c.h.bf16 %v1565_v1  ;;  %1954 = vset.pattern.permute.xlu0 %v1992_v10  ;;  %1955 = vset.pattern.permute.xlu1 %v1992_v10  ;;  %v1589_v17 = vld [vmem:[%s2475_s1 + $0x48] sm:$0xff]   ;;  %vm2072_vm1 = vmpackc.low %vm328_vm0, %vm328_vm0  ;;  %v1404_v30 = vunpack.c.l.bf16 %v1566_v16  ;;  %v1405_v31 = vunpack.c.h.bf16 %v1566_v16 }
   0x5   :  { %v1573_v3 = vld [vmem:[%s2474_s0 + $0x80] sm:$0xff]   ;;  %v1496_v6 = vunpack.c.l.bf16 %v1588_v2  ;;  %v1497_v7 = vunpack.c.h.bf16 %v1588_v2  ;;  %v1574_v27 = vld [vmem:[%s2474_s0 + $0x88] sm:$0xff]   ;;  %v1500_v32 = vunpack.c.l.bf16 %v1589_v17  ;;  %v1501_v37 = vunpack.c.h.bf16 %v1589_v17  ;;  %v1590_v48 = vld [vmem:[%s2475_s1 + $0x50] sm:$0xff]  }
   0x6   :  { %v1596_v8 = vld [vmem:[%s2475_s1 + $0x80] sm:$0xff]   ;;  %v1432_v11 = vunpack.c.l.bf16 %v1573_v3  ;;  %v1433_v12 = vunpack.c.h.bf16 %v1573_v3  ;;  %v1597_v28 = vld [vmem:[%s2475_s1 + $0x88] sm:$0xff]   ;;  %v1436_v40 = vunpack.c.l.bf16 %v1574_v27  ;;  %v1437_v41 = vunpack.c.h.bf16 %v1574_v27  ;;  %v1575_v53 = vld [vmem:[%s2474_s0 + $0x90] sm:$0xff]  }
   0x7   :  { %v1367_v9 = vld [vmem:[%s2474_s0] sm:$0xff]   ;;  %v1528_v13 = vunpack.c.l.bf16 %v1596_v8  ;;  %v1529_v14 = vunpack.c.h.bf16 %v1596_v8  ;;  %v240_v18 = vmul.f32 %v1496_v6, %v1400_v4  ;;  %v241_v19 = vmul.f32 %v1497_v7, %v1401_v5  ;;  %v1558_v33 = vld [vmem:[%s2474_s0 + $0x8] sm:$0xff]   ;;  %v1598_v54 = vld [vmem:[%s2475_s1 + $0x90] sm:$0xff]  }
   0x8   :  { %v1463_v15 = vld [vmem:[%s2475_s1] sm:$0xff]   ;;  %v1368_v20 = vunpack.c.l.bf16 %v1367_v9  ;;  %v1369_v21 = vunpack.c.h.bf16 %v1367_v9  ;;  %v1581_v38 = vld [vmem:[%s2475_s1 + $0x8] sm:$0xff]   ;;  %v242_v39 = vmul.f32 %v1500_v32, %v1404_v30  ;;  %v1532_v42 = vunpack.c.l.bf16 %v1597_v28  ;;  %v1559_v63 = vld [vmem:[%s2474_s0 + $0x10] sm:$0xff]  }
   0x9   :  { %v256_v23 = vmul.f32 %v1528_v13, %v1432_v11  ;;  %v257_v24 = vmul.f32 %v1529_v14, %v1433_v12  ;;  %v1464_v25 = vunpack.c.l.bf16 %v1463_v15  ;;  %v1465_v26 = vunpack.c.h.bf16 %v1463_v15  ;;  %v1582_v0 = vld [vmem:[%s2475_s1 + $0x10] sm:$0xff]   ;;  %v1568_v5 = vld [vmem:[%s2474_s0 + $0x58] sm:$0xff]  }
   0xa   :  { %v1792_v29 = vpack.c.bf16 %v241_v19, %v240_v18  ;;  %v243_v45 = vmul.f32 %v1501_v37, %v1405_v31  ;;  %v1533_v46 = vunpack.c.h.bf16 %v1597_v28  ;;  %v1372_v47 = vunpack.c.l.bf16 %v1558_v33  ;;  %v1591_v10 = vld [vmem:[%s2475_s1 + $0x58] sm:$0xff]   ;;  %v2139_v28 = vld [vmem:[%s2476_s2] sm:$0xff] }
   0xb   :  { %v1840_v34 = vpack.c.bf16 %v257_v24, %v256_v23  ;;  %v224_v35 = vmul.f32 %v1464_v25, %v1368_v20  ;;  %v225_v36 = vmul.f32 %v1465_v26, %v1369_v21  ;;  %v258_v49 = vmul.f32 %v1532_v42, %v1436_v40  ;;  %v1576_v15 = vld [vmem:[%s2474_s0 + $0x98] sm:$0xff]   ;;  %1636 = vmatprep.mubr.msk.f32.mxu0 %vm328_vm0, %v2139_v28  ;;  %v1569_v37 = vld [vmem:[%s2474_s0 + $0x60] sm:$0xff]  }
   0xc   :  { %1794 = vmatprep.subr.msk.bf16.mxu0 %vm2072_vm1, %v1792_v29  ;;  %v1373_v50 = vunpack.c.h.bf16 %v1558_v33  ;;  %v1468_v51 = vunpack.c.l.bf16 %v1581_v38  ;;  %v1469_v52 = vunpack.c.h.bf16 %v1581_v38  ;;  %v1798_v55 = vpack.c.bf16 %v243_v45, %v242_v39  ;;  %v1599_v20 = vld [vmem:[%s2475_s1 + $0x98] sm:$0xff]   ;;  %v1592_v38 = vld [vmem:[%s2475_s1 + $0x60] sm:$0xff]   ;;  %1733 = vmatprep.mubr.msk.f32.mxu1 %vm328_vm0, %v2139_v28 }
   0xd   :  { %1842 = vmatprep.subr.msk.bf16.mxu1 %vm2072_vm1, %v1840_v34  ;;  %v1795_v44 = vpack.c.bf16 %v225_v36, %v224_v35  ;;  %v259_v56 = vmul.f32 %v1533_v46, %v1437_v41  ;;  %v1408_v57 = vunpack.c.l.bf16 %v1567_v43  ;;  %v1409_v58 = vunpack.c.h.bf16 %v1567_v43  ;;  %v1560_v26 = vld [vmem:[%s2474_s0 + $0x18] sm:$0xff]   ;;  %v1577_v42 = vld [vmem:[%s2474_s0 + $0xa0] sm:$0xff]  }
   0xe   :  { %1845 = vmatpush3.bf16.xpose.msk.msra.mxu1 %vm2072_vm1, %v1840_v34  ;;  %v226_v59 = vmul.f32 %v1468_v51, %v1372_v47  ;;  %v227_v60 = vmul.f32 %v1469_v52, %v1373_v50  ;;  %v1504_v61 = vunpack.c.l.bf16 %v1590_v48  ;;  %v1505_v62 = vunpack.c.h.bf16 %v1590_v48  ;;  %v1583_v27 = vld [vmem:[%s2475_s1 + $0x18] sm:$0xff]   ;;  %v280_v43 = vld [vmem:[%s2477_s3] sm:$0xff] }
   0xf   :  { %1797 = vmatpush3.bf16.xpose.msk.msra.mxu0 %vm2072_vm1, %v1795_v44  ;;  %v1846_v1 = vpack.c.bf16 %v259_v56, %v258_v49  ;;  %v1440_v2 = vunpack.c.l.bf16 %v1575_v53  ;;  %v1441_v3 = vunpack.c.h.bf16 %v1575_v53  ;;  %v1536_v4 = vunpack.c.l.bf16 %v1598_v54  ;;  %v282_v44 = vld [vmem:[%s2477_s3 + $0x10] sm:$0xff]  ;;  %v1600_v49 = vld [vmem:[%s2475_s1 + $0xa0] sm:$0xff]   ;;  %290 = vperm.xlu0 %1954, %v280_v43  }
  0x10   :  { %1800 = vmatprep.subr.msk.bf16.mxu0 %vm2072_vm1, %v1798_v55  ;;  %v1801_v6 = vpack.c.bf16 %v227_v60, %v226_v59  ;;  %v244_v7 = vmul.f32 %v1504_v61, %v1408_v57  ;;  %v245_v8 = vmul.f32 %v1505_v62, %v1409_v58  ;;  %v1537_v9 = vunpack.c.h.bf16 %v1598_v54  ;;  %300 = vperm.xlu1 %1955, %v282_v44   ;;  %v281_v54 = vld [vmem:[%s2477_s3 + $0x8] sm:$0xff]  ;;  %v283_v55 = vld [vmem:[%s2477_s3 + $0x18] sm:$0xff] }
  0x11   :  { %1848 = vmatprep.subr.msk.bf16.mxu1 %vm2072_vm1, %v1846_v1  ;;  %v260_v11 = vmul.f32 %v1536_v4, %v1440_v2  ;;  %v1376_v12 = vunpack.c.l.bf16 %v1559_v63  ;;  %v1377_v13 = vunpack.c.h.bf16 %v1559_v63  ;;  %v1472_v14 = vunpack.c.l.bf16 %v1582_v0 }
  0x12   :  { %v1804_v16 = vpack.c.bf16 %v245_v8, %v244_v7  ;;  %v261_v17 = vmul.f32 %v1537_v9, %v1441_v3  ;;  %v1473_v18 = vunpack.c.h.bf16 %v1582_v0  ;;  %v1412_v19 = vunpack.c.l.bf16 %v1568_v5  ;;  %v1561_v0 = vld [vmem:[%s2474_s0 + $0x20] sm:$0xff]  }
  0x13   :  { %v228_v21 = vmul.f32 %v1472_v14, %v1376_v12  ;;  %v1413_v23 = vunpack.c.h.bf16 %v1568_v5  ;;  %v1508_v24 = vunpack.c.l.bf16 %v1591_v10  ;;  %v1509_v25 = vunpack.c.h.bf16 %v1591_v10  ;;  %295 = vperm.xlu0 %1954, %v281_v54  }
  0x14   :  { %v1852_v29 = vpack.c.bf16 %v261_v17, %v260_v11  ;;  %v229_v30 = vmul.f32 %v1473_v18, %v1377_v13  ;;  %v1444_v31 = vunpack.c.l.bf16 %v1576_v15  ;;  %v1445_v32 = vunpack.c.h.bf16 %v1576_v15  ;;  %305 = vperm.xlu1 %1955, %v283_v55  }
  0x15   :  { %v246_v33 = vmul.f32 %v1508_v24, %v1412_v19  ;;  %v247_v34 = vmul.f32 %v1509_v25, %v1413_v23  ;;  %v1540_v35 = vunpack.c.l.bf16 %v1599_v20  ;;  %v1541_v36 = vunpack.c.h.bf16 %v1599_v20 }
  0x16   :  { %1851 = vmatpush3.bf16.xpose.msk.msra.mxu1 %vm2072_vm1, %v1846_v1  ;;  %v1380_v39 = vunpack.c.l.bf16 %v1560_v26  ;;  %v1381_v40 = vunpack.c.h.bf16 %v1560_v26  ;;  %v1476_v41 = vunpack.c.l.bf16 %v1583_v27  ;;  %v1807_v45 = vpack.c.bf16 %v229_v30, %v228_v21  ;;  %v1584_v1 = vld [vmem:[%s2475_s1 + $0x20] sm:$0xff]  }
  0x17   :  { %1803 = vmatpush3.bf16.xpose.msk.msra.mxu0 %vm2072_vm1, %v1801_v6  ;;  %1854 = vmatprep.subr.msk.bf16.mxu1 %vm2072_vm1, %v1852_v29  ;;  %v262_v46 = vmul.f32 %v1540_v35, %v1444_v31  ;;  %v263_v47 = vmul.f32 %v1541_v36, %v1445_v32  ;;  %v1477_v48 = vunpack.c.h.bf16 %v1583_v27  ;;  %v1810_v50 = vpack.c.bf16 %v247_v34, %v246_v33 }
  0x18   :  { %1806 = vmatprep.subr.msk.bf16.mxu0 %vm2072_vm1, %v1804_v16  ;;  %v2171_v51 = vmul.f32 %v1476_v41, %v1380_v39  ;;  %v1416_v52 = vunpack.c.l.bf16 %v1569_v37  ;;  %v1417_v53 = vunpack.c.h.bf16 %v1569_v37  ;;  %v1512_v58 = vunpack.c.l.bf16 %v1592_v38 }
  0x19   :  { %v1858_v56 = vpack.c.bf16 %v263_v47, %v262_v46  ;;  %v231_v57 = vmul.f32 %v1477_v48, %v1381_v40  ;;  %v1448_v59 = vunpack.c.l.bf16 %v1577_v42  ;;  %v1513_v60 = vunpack.c.h.bf16 %v1592_v38 }
  0x1a   :  { %v1449_v61 = vunpack.c.h.bf16 %v1577_v42  ;;  %v1544_v62 = vunpack.c.l.bf16 %v1600_v49  ;;  %v1545_v63 = vunpack.c.h.bf16 %v1600_v49 }
  0x1b   :  { %15 = vsyncpa [#allocation4], 0  ;;  %v1570_v4 = vld [vmem:[%s2474_s0 + $0x68] sm:$0xff]   ;;  %v284_v5 = vld [vmem:[%s2477_s3 + $0x20] sm:$0xff]  ;;  %v1813_v8 = vpack.c.bf16 %v231_v57, %v2171_v51  ;;  %v248_v9 = vmul.f32 %v1512_v58, %v1416_v52  ;;  %v249_v10 = vmul.f32 %v1513_v60, %v1417_v53  ;;  %v1384_v11 = vunpack.c.l.bf16 %v1561_v0 }
  0x1c   :  { %v264_v2 = vmul.f32 %v1544_v62, %v1448_v59  ;;  %v265_v3 = vmul.f32 %v1545_v63, %v1449_v61  ;;  %v285_v6 = vld [vmem:[%s2477_s3 + $0x28] sm:$0xff]  ;;  %v1385_v14 = vunpack.c.h.bf16 %v1561_v0  ;;  %v1480_v15 = vunpack.c.l.bf16 %v1584_v1  ;;  %310 = vperm.xlu0 %1954, %v284_v5   ;;  %v286_v23 = vld [vmem:[%s2477_s3 + $0x30] sm:$0xff]  ;;  %v287_v24 = vld [vmem:[%s2477_s3 + $0x38] sm:$0xff] }
  0x1d   :  { %v1593_v7 = vld [vmem:[%s2475_s1 + $0x68] sm:$0xff]   ;;  %v1481_v16 = vunpack.c.h.bf16 %v1584_v1  ;;  %v1420_v17 = vunpack.c.l.bf16 %v1570_v4  ;;  %315 = vperm.xlu1 %1955, %v285_v6   ;;  %v1421_v19 = vunpack.c.h.bf16 %v1570_v4  ;;  %v1816_v30 = vpack.c.bf16 %v249_v10, %v248_v9  ;;  %v1571_v33 = vld [vmem:[%s2474_s0 + $0x70] sm:$0xff]   ;;  %v747_v38 = vld [vmem:[%s2479_s5] sm:$0xff] }
  0x1e   :  { %1857 = vmatpush3.bf16.xpose.msk.msra.mxu1 %vm2072_vm1, %v1852_v29  ;;  %v1578_v12 = vld [vmem:[%s2474_s0 + $0xa8] sm:$0xff]   ;;  %v1864_v18 = vpack.c.bf16 %v265_v3, %v264_v2  ;;  %v1516_v20 = vunpack.c.l.bf16 %v1593_v7  ;;  %v1517_v21 = vunpack.c.h.bf16 %v1593_v7  ;;  %v232_v34 = vmul.f32 %v1480_v15, %v1384_v11  ;;  %v1594_v37 = vld [vmem:[%s2475_s1 + $0x70] sm:$0xff]   ;;  %v750_v58 = vld [vmem:[%s2479_s5 + $0x18] sm:$0xff] }
  0x1f   :  { %1809 = vmatpush3.bf16.xpose.msk.msra.mxu0 %vm2072_vm1, %v1807_v45  ;;  %1860 = vmatprep.subr.msk.bf16.mxu1 %vm2072_vm1, %v1858_v56  ;;  %v1601_v13 = vld [vmem:[%s2475_s1 + $0xa8] sm:$0xff]   ;;  %v1452_v25 = vunpack.c.l.bf16 %v1578_v12  ;;  %v1453_v26 = vunpack.c.h.bf16 %v1578_v12  ;;  %v233_v35 = vmul.f32 %v1481_v16, %v1385_v14  ;;  %v1579_v43 = vld [vmem:[%s2474_s0 + $0xb0] sm:$0xff]   ;;  %v1424_v49 = vunpack.c.l.bf16 %v1571_v33  ;;  %v751_v5 = vld [vmem:[%s2479_s5 + $0x20] sm:$0xff] }
  0x20   :  { %1812 = vmatprep.subr.msk.bf16.mxu0 %vm2072_vm1, %v1810_v50  ;;  %v1548_v27 = vunpack.c.l.bf16 %v1601_v13  ;;  %v1549_v29 = vunpack.c.h.bf16 %v1601_v13  ;;  %v1562_v31 = vld [vmem:[%s2474_s0 + $0x28] sm:$0xff]   ;;  %320 = vperm.xlu0 %1954, %v286_v23   ;;  %v250_v36 = vmul.f32 %v1516_v20, %v1420_v17  ;;  %v251_v40 = vmul.f32 %v1517_v21, %v1421_v19  ;;  %v1602_v44 = vld [vmem:[%s2475_s1 + $0xb0] sm:$0xff]   ;;  %v1603_v9 = vld [vmem:[%s2475_s1 + $0xb8] sm:$0xff]  }
  0x21   :  { %v1585_v32 = vld [vmem:[%s2475_s1 + $0x28] sm:$0xff]   ;;  %325 = vperm.xlu1 %1955, %v287_v24   ;;  %v1388_v45 = vunpack.c.l.bf16 %v1562_v31  ;;  %v1389_v46 = vunpack.c.h.bf16 %v1562_v31  ;;  %v1425_v50 = vunpack.c.h.bf16 %v1571_v33  ;;  %v1520_v51 = vunpack.c.l.bf16 %v1594_v37  ;;  %v749_v57 = vld [vmem:[%s2479_s5 + $0x10] sm:$0xff]  ;;  %v1572_v13 = vld [vmem:[%s2474_s0 + $0x78] sm:$0xff]  }
  0x22   :  { %v748_v39 = vld [vmem:[%s2479_s5 + $0x8] sm:$0xff]  ;;  %v266_v41 = vmul.f32 %v1548_v27, %v1452_v25  ;;  %v267_v42 = vmul.f32 %v1549_v29, %v1453_v26  ;;  %v1484_v47 = vunpack.c.l.bf16 %v1585_v32  ;;  %v1485_v48 = vunpack.c.h.bf16 %v1585_v32  ;;  %v1563_v4 = vld [vmem:[%s2474_s0 + $0x30] sm:$0xff]   ;;  %v1595_v14 = vld [vmem:[%s2475_s1 + $0x78] sm:$0xff]  }
  0x23   :  { %v1521_v52 = vunpack.c.h.bf16 %v1594_v37  ;;  %v1456_v53 = vunpack.c.l.bf16 %v1579_v43  ;;  %v1457_v54 = vunpack.c.h.bf16 %v1579_v43  ;;  %v1552_v55 = vunpack.c.l.bf16 %v1602_v44  ;;  %v752_v6 = vld [vmem:[%s2479_s5 + $0x28] sm:$0xff]  ;;  %v1586_v7 = vld [vmem:[%s2475_s1 + $0x30] sm:$0xff]   ;;  %v754_v20 = vld [vmem:[%s2479_s5 + $0x38] sm:$0xff] }
  0x24   :  { %757 = vperm.xlu0 %1954, %v747_v38   ;;  %v1819_v59 = vpack.c.bf16 %v233_v35, %v232_v34  ;;  %v1870_v60 = vpack.c.bf16 %v267_v42, %v266_v41  ;;  %v1822_v61 = vpack.c.bf16 %v251_v40, %v250_v36  ;;  %v234_v62 = vmul.f32 %v1484_v47, %v1388_v45  ;;  %v753_v19 = vld [vmem:[%s2479_s5 + $0x30] sm:$0xff]  ;;  %v1063_v33 = vld [vmem:[#allocation2] sm:$0x1]  ;;  %v1564_v36 = vld [vmem:[%s2474_s0 + $0x38] sm:$0xff]  }
  0x25   :  { %762 = vperm.xlu1 %1955, %v748_v39   ;;  %v235_v63 = vmul.f32 %v1485_v48, %v1389_v46  ;;  %v252_v0 = vmul.f32 %v1520_v51, %v1424_v49  ;;  %v253_v1 = vmul.f32 %v1521_v52, %v1425_v50  ;;  %v268_v2 = vmul.f32 %v1552_v55, %v1456_v53  ;;  %v1587_v39 = vld [vmem:[%s2475_s1 + $0x38] sm:$0xff]   ;;  %v273_v50 = vld [vmem:[%s2476_s2 + $0x8] sm:$0xff]  ;;  %v274_v51 = vld [vmem:[%s2476_s2 + $0x10] sm:$0xff] }
  0x26   :  { %1863 = vmatpush3.bf16.xpose.msk.msra.mxu1 %vm2072_vm1, %v1858_v56  ;;  %v1553_v56 = vunpack.c.h.bf16 %v1602_v44  ;;  %v1392_v11 = vunpack.c.l.bf16 %v1563_v4  ;;  %v1393_v12 = vunpack.c.h.bf16 %v1563_v4  ;;  %v1488_v17 = vunpack.c.l.bf16 %v1586_v7  ;;  %v275_v22 = vld [vmem:[%s2476_s2 + $0x18] sm:$0xff]  ;;  %v276_v52 = vld [vmem:[%s2476_s2 + $0x20] sm:$0xff]  ;;  %v278_v53 = vld [vmem:[%s2476_s2 + $0x30] sm:$0xff] }
  0x27   :  { %1815 = vmatpush3.bf16.xpose.msk.msra.mxu0 %vm2072_vm1, %v1813_v8  ;;  %1866 = vmatprep.subr.msk.bf16.mxu1 %vm2072_vm1, %v1864_v18  ;;  %v1580_v8 = vld [vmem:[%s2474_s0 + $0xb8] sm:$0xff]   ;;  %v1825_v10 = vpack.c.bf16 %v235_v63, %v234_v62  ;;  %v1828_v15 = vpack.c.bf16 %v253_v1, %v252_v0  ;;  %v1556_v24 = vunpack.c.l.bf16 %v1603_v9  ;;  %v1557_v25 = vunpack.c.h.bf16 %v1603_v9  ;;  %v2367_v55 = vld [vmem:[%s2478_s4] sm:$0xff] }
  0x28   :  { %1818 = vmatprep.subr.msk.bf16.mxu0 %vm2072_vm1, %v1816_v30  ;;  %767 = vperm.xlu0 %1954, %v749_v57   ;;  %v269_v3 = vmul.f32 %v1553_v56, %v1457_v54  ;;  %v1460_v21 = vunpack.c.l.bf16 %v1580_v8  ;;  %v1461_v23 = vunpack.c.h.bf16 %v1580_v8  ;;  %v1428_v26 = vunpack.c.l.bf16 %v1572_v13  ;;  %v279_v54 = vld [vmem:[%s2476_s2 + $0x38] sm:$0xff] }
  0x29   :  { %772 = vperm.xlu1 %1955, %v750_v58   ;;  %v1429_v27 = vunpack.c.h.bf16 %v1572_v13  ;;  %v1524_v29 = vunpack.c.l.bf16 %v1595_v14  ;;  %v1525_v30 = vunpack.c.h.bf16 %v1595_v14  ;;  %v236_v31 = vmul.f32 %v1488_v17, %v1392_v11 }
  0x2a   :  { %v1876_v16 = vpack.c.bf16 %v269_v3, %v268_v2  ;;  %v270_v34 = vmul.f32 %v1556_v24, %v1460_v21  ;;  %v271_v35 = vmul.f32 %v1557_v25, %v1461_v23  ;;  %v1396_v41 = vunpack.c.l.bf16 %v1564_v36 }
  0x2b   :  { %v254_v37 = vmul.f32 %v1524_v29, %v1428_v26  ;;  %v255_v38 = vmul.f32 %v1525_v30, %v1429_v27  ;;  %v1397_v43 = vunpack.c.h.bf16 %v1564_v36  ;;  %v1492_v44 = vunpack.c.l.bf16 %v1587_v39 }
  0x2c   :  { %777 = vperm.xlu0 %1954, %v751_v5   ;;  %v1882_v42 = vpack.c.bf16 %v271_v35, %v270_v34  ;;  %v1493_v45 = vunpack.c.h.bf16 %v1587_v39  ;;  %vm795_vm2 = vcmask 523264   ;;  %v1993_v56 = vmov 0.0  }
  0x2d   :  { %782 = vperm.xlu1 %1955, %v752_v6   ;;  %v1834_v46 = vpack.c.bf16 %v255_v38, %v254_v37  ;;  %v238_v47 = vmul.f32 %v1492_v44, %v1396_v41  ;;  %vm1995_vm3 = vmmov 0  }
  0x2e   :  { %1869 = vmatpush3.bf16.xpose.msk.msra.mxu1 %vm2072_vm1, %v1864_v18  ;;  %v1489_v18 = vunpack.c.h.bf16 %v1586_v7  ;;  %v239_v48 = vmul.f32 %v1493_v45, %v1397_v43 }
  0x2f   :  { %1821 = vmatpush3.bf16.xpose.msk.msra.mxu0 %vm2072_vm1, %v1819_v59  ;;  %1872 = vmatprep.subr.msk.bf16.mxu1 %vm2072_vm1, %v1870_v60 }
  0x30   :  { %1824 = vmatprep.subr.msk.bf16.mxu0 %vm2072_vm1, %v1822_v61  ;;  %787 = vperm.xlu0 %1954, %v753_v19   ;;  %v237_v32 = vmul.f32 %v1489_v18, %v1393_v12  ;;  %v1837_v49 = vpack.c.bf16 %v239_v48, %v238_v47 }
  0x31   :  { %792 = vperm.xlu1 %1955, %v754_v20  }
  0x32   :  { %v1831_v40 = vpack.c.bf16 %v237_v32, %v236_v31 }
  0x34   :  { %1066 = vperm.xlu0 %1954, %v1063_v33  }
  0x36   :  { %1875 = vmatpush3.bf16.xpose.msk.msra.mxu1 %vm2072_vm1, %v1870_v60 }
  0x37   :  { %1827 = vmatpush3.bf16.xpose.msk.msra.mxu0 %vm2072_vm1, %v1825_v10  ;;  %1878 = vmatprep.subr.msk.bf16.mxu1 %vm2072_vm1, %v1876_v16 }
  0x38   :  { %1830 = vmatprep.subr.msk.bf16.mxu0 %vm2072_vm1, %v1828_v15 }
  0x3e   :  { %1881 = vmatpush3.bf16.xpose.msk.msra.mxu1 %vm2072_vm1, %v1876_v16 }
  0x3f   :  { %1833 = vmatpush3.bf16.xpose.msk.msra.mxu0 %vm2072_vm1, %v1831_v40  ;;  %1884 = vmatprep.subr.msk.bf16.mxu1 %vm2072_vm1, %v1882_v42 }
  0x40   :  { %1836 = vmatprep.subr.msk.bf16.mxu0 %vm2072_vm1, %v1834_v46 }
  0x46   :  { %1887 = vmatpush3.bf16.xpose.msk.msra.mxu1 %vm2072_vm1, %v1882_v42 }
  0x47   :  { %1839 = vmatpush3.bf16.xpose.msk.msra.mxu0 %vm2072_vm1, %v1837_v49 }
  0x4d   :  { %1734 = vmatmul.mubr.msk.f32.vlgmr.msra.gmra.mrb[0].mxu1 %vm328_vm0, %v273_v50 }
  0x4e   :  { %1637 = vmatmul.mubr.msk.f32.vlgmr.msra.gmra.mrb[0].mxu0 %vm328_vm0, %v2139_v28  ;;  %1736 = vmatprep.mubr.msk.f32.mxu1 %vm328_vm0, %v274_v51  ;;  %v277_v28 = vld [vmem:[%s2476_s2 + $0x28] sm:$0xff] }
  0x4f   :  { %1638 = vmatprep.mubr.msk.f32.mxu0 %vm328_vm0, %v273_v50 }
  0x51   :  { %1737 = vmatmul.mubr.msk.f32.gmra.mrb[2].mxu1 %vm328_vm0, %v275_v22 }
  0x52   :  { %1639 = vmatmul.mubr.msk.f32.gmra.mrb[2].mxu0 %vm328_vm0, %v273_v50  ;;  %1739 = vmatprep.mubr.msk.f32.mxu1 %vm328_vm0, %v276_v52 }
  0x53   :  { %1640 = vmatprep.mubr.msk.f32.mxu0 %vm328_vm0, %v274_v51 }
  0x55   :  { %1740 = vmatmul.mubr.msk.f32.gmra.mrb[4].mxu1 %vm328_vm0, %v277_v28 }
  0x56   :  { %1641 = vmatmul.mubr.msk.f32.gmra.mrb[4].mxu0 %vm328_vm0, %v274_v51  ;;  %1742 = vmatprep.mubr.msk.f32.mxu1 %vm328_vm0, %v278_v53 }
  0x57   :  { %1642 = vmatprep.mubr.msk.f32.mxu0 %vm328_vm0, %v275_v22 }
  0x59   :  { %1743 = vmatmul.mubr.msk.f32.gmra.mrb[6].mxu1 %vm328_vm0, %v279_v54 }
  0x5a   :  { %1643 = vmatmul.mubr.msk.f32.gmra.mrb[6].mxu0 %vm328_vm0, %v275_v22  ;;  %884 = vmatprep.mubr.f32.mxu1 %v1993_v56 }
  0x5b   :  { %1644 = vmatprep.mubr.msk.f32.mxu0 %vm328_vm0, %v276_v52 }
  0x5e   :  { %1645 = vmatmul.mubr.msk.f32.gmra.mrb[8].mxu0 %vm328_vm0, %v276_v52 }
  0x5f   :  { %1646 = vmatprep.mubr.msk.f32.mxu0 %vm328_vm0, %v277_v28 }
  0x62   :  { %1647 = vmatmul.mubr.msk.f32.gmra.mrb[10].mxu0 %vm328_vm0, %v277_v28 }
  0x63   :  { %1648 = vmatprep.mubr.msk.f32.mxu0 %vm328_vm0, %v278_v53 }
  0x66   :  { %1649 = vmatmul.mubr.msk.f32.gmra.mrb[12].mxu0 %vm328_vm0, %v278_v53 }
  0x67   :  { %1650 = vmatprep.mubr.msk.f32.mxu0 %vm328_vm0, %v279_v54 }
  0x6a   :  { %1651 = vmatmul.mubr.msk.f32.gmra.mrb[14].mxu0 %vm328_vm0, %v279_v54 }
  0x6b   :  { %1761 = vmatprep.mubr.msk.f32.mxu0 %vm795_vm2, %v2367_v55 }
  0x8e   :  { %v291_v57 = vpop.permute.xlu0 %290 }
  0x8f   :  { %v301_v58 = vpop.permute.xlu1 %300 }
  0x92   :  { %v296_v59 = vpop.permute.xlu0 %295 }
  0x93   :  { %v306_v60 = vpop.permute.xlu1 %305 }
  0x9b   :  { %v2372_v4 = vpop.permute.xlu0 %310 }
  0x9c   :  { %v2374_v12 = vpop.permute.xlu1 %315 }
  0x9f   :  { %v321_v34 = vpop.permute.xlu0 %320 }
  0xa0   :  { %v2378_v37 = vpop.permute.xlu1 %325 }
 0x120   :  { %v1735_v61 = vpop.f32.mrb[0].mxu1 }
 0x121   :  { %v563_v62 = vpop.f32.mrb[0].mxu0  ;;  %v682_v63 = vadd.f32 %v1735_v61, %v296_v59  ;;  %v676_v0 = vpop.f32.mrb[1].mxu1 }
 0x122   :  { %v565_v1 = vpop.f32.mrb[1].mxu0  ;;  %v677_v2 = vadd.f32 %v676_v0, %v291_v57  ;;  %v564_v5 = vadd.f32 %v563_v62, %v291_v57 }
 0x123   :  { %v720_v3 = vmax.f32 %v682_v63, 0.0  ;;  %v566_v8 = vadd.f32 %v565_v1, %v291_v57 }
 0x124   :  { %v717_v6 = vmax.f32 %v677_v2, 0.0  ;;  %v1738_v7 = vpop.f32.mrb[2].mxu1  ;;  %v715_v19 = vmax.f32 %v564_v5, 0.0 }
 0x125   :  { %v569_v9 = vpop.f32.mrb[2].mxu0  ;;  %v692_v10 = vadd.f32 %v1738_v7, %v306_v60  ;;  %v686_v11 = vpop.f32.mrb[3].mxu1  ;;  %v716_v24 = vmax.f32 %v566_v8, 0.0 }
 0x126   :  { %v1904_v13 = vpack.c.bf16 %v720_v3, %v717_v6  ;;  %v570_v14 = vadd.f32 %v569_v9, %v296_v59  ;;  %v571_v15 = vpop.f32.mrb[3].mxu0  ;;  %v687_v16 = vadd.f32 %v686_v11, %v301_v58  ;;  %v741_v3 = vld [vmem:[%s2478_s4 + $0x10] sm:$0xff] }
 0x127   :  { %v726_v17 = vmax.f32 %v692_v10, 0.0  ;;  %v572_v18 = vadd.f32 %v571_v15, %v296_v59  ;;  %v742_v10 = vld [vmem:[%s2478_s4 + $0x18] sm:$0xff] }
 0x128   :  { %v718_v20 = vmax.f32 %v570_v14, 0.0  ;;  %v723_v21 = vmax.f32 %v687_v16, 0.0  ;;  %v1741_v23 = vpop.f32.mrb[4].mxu1  ;;  %1905 = vmatprep.subr.bf16.mxu0 %v1904_v13  ;;  %v743_v14 = vld [vmem:[%s2478_s4 + $0x20] sm:$0xff] }
 0x129   :  { %v719_v25 = vmax.f32 %v572_v18, 0.0  ;;  %v575_v26 = vpop.f32.mrb[4].mxu0  ;;  %v702_v27 = vadd.f32 %v1741_v23, %v2374_v12  ;;  %v696_v29 = vpop.f32.mrb[5].mxu1  ;;  %1907 = vmatpush3.bf16.msra.mxu0 %v1904_v13  ;;  %v744_v18 = vld [vmem:[%s2478_s4 + $0x28] sm:$0xff] }
 0x12a   :  { %v1890_v30 = vpack.c.bf16 %v718_v20, %v715_v19  ;;  %v1908_v31 = vpack.c.bf16 %v726_v17, %v723_v21  ;;  %v577_v32 = vpop.f32.mrb[5].mxu0  ;;  %v697_v33 = vadd.f32 %v696_v29, %v2372_v4  ;;  %v576_v38 = vadd.f32 %v575_v26, %v301_v58  ;;  %v745_v21 = vld [vmem:[%s2478_s4 + $0x30] sm:$0xff]  ;;  %v746_v29 = vld [vmem:[%s2478_s4 + $0x38] sm:$0xff] }
 0x12b   :  { %v1888_v35 = vpack.c.bf16 %v719_v25, %v716_v24  ;;  %v732_v36 = vmax.f32 %v702_v27, 0.0  ;;  %v578_v41 = vadd.f32 %v577_v32, %v301_v58  ;;  %v763_v32 = vpop.permute.xlu1 %762 }
 0x12c   :  { %v729_v39 = vmax.f32 %v697_v33, 0.0  ;;  %v1744_v40 = vpop.f32.mrb[6].mxu1  ;;  %1909 = vmatprep.subr.bf16.mxu0 %v1908_v31  ;;  %v721_v51 = vmax.f32 %v576_v38, 0.0  ;;  %v758_v33 = vpop.permute.xlu0 %757 }
 0x12d   :  { %v581_v42 = vpop.f32.mrb[6].mxu0  ;;  %v712_v43 = vadd.f32 %v1744_v40, %v2378_v37  ;;  %1889 = vmatprep.subr.bf16.mxu1 %v1888_v35  ;;  %v706_v44 = vpop.f32.mrb[7].mxu1  ;;  %1911 = vmatpush3.bf16.msra.mxu0 %v1908_v31  ;;  %v722_v28 = vmax.f32 %v578_v41, 0.0 }
 0x12e   :  { %v1912_v45 = vpack.c.bf16 %v732_v36, %v729_v39  ;;  %v582_v46 = vadd.f32 %v581_v42, %v306_v60  ;;  %v583_v47 = vpop.f32.mrb[7].mxu0  ;;  %v707_v48 = vadd.f32 %v706_v44, %v321_v34  ;;  %1891 = vmatpush1.bf16.msra.mxu1 %v1890_v30 }
 0x12f   :  { %v738_v49 = vmax.f32 %v712_v43, 0.0  ;;  %v584_v50 = vadd.f32 %v583_v47, %v306_v60  ;;  %v740_v60 = vld [vmem:[%s2478_s4 + $0x8] sm:$0xff] }
 0x130   :  { %v724_v22 = vmax.f32 %v582_v46, 0.0  ;;  %v735_v52 = vmax.f32 %v707_v48, 0.0  ;;  %1913 = vmatprep.subr.bf16.mxu0 %v1912_v45  ;;  %v768_v36 = vpop.permute.xlu0 %767 }
 0x131   :  { %v725_v53 = vmax.f32 %v584_v50, 0.0  ;;  %v587_v54 = vpop.f32.mrb[8].mxu0  ;;  %1915 = vmatpush3.bf16.msra.mxu0 %v1912_v45 }
 0x132   :  { %v1894_v57 = vpack.c.bf16 %v724_v22, %v721_v51  ;;  %v1916_v58 = vpack.c.bf16 %v738_v49, %v735_v52  ;;  %v589_v59 = vpop.f32.mrb[9].mxu0  ;;  %v588_v62 = vadd.f32 %v587_v54, %v2372_v4 }
 0x133   :  { %v1892_v61 = vpack.c.bf16 %v725_v53, %v722_v28  ;;  %v590_v63 = vadd.f32 %v589_v59, %v2372_v4 }
 0x134   :  { %1917 = vmatprep.subr.bf16.mxu0 %v1916_v58  ;;  %v727_v6 = vmax.f32 %v588_v62, 0.0 }
 0x135   :  { %v593_v0 = vpop.f32.mrb[10].mxu0  ;;  %1893 = vmatprep.subr.bf16.mxu1 %v1892_v61  ;;  %1919 = vmatpush3.bf16.msra.mxu0 %v1916_v58  ;;  %v728_v4 = vmax.f32 %v590_v63, 0.0 }
 0x136   :  { %v594_v1 = vadd.f32 %v593_v0, %v2374_v12  ;;  %v595_v2 = vpop.f32.mrb[11].mxu0  ;;  %1895 = vmatpush1.bf16.msra.mxu1 %v1894_v57 }
 0x137   :  { %v596_v5 = vadd.f32 %v595_v2, %v2374_v12 }
 0x138   :  { %v730_v7 = vmax.f32 %v594_v1, 0.0  ;;  %1762 = vmatmul.mubr.msk.f32.vlgmr.msra.gmra.mrb[16].mxu0 %vm795_vm2, %v740_v60 }
 0x139   :  { %v731_v8 = vmax.f32 %v596_v5, 0.0  ;;  %v599_v9 = vpop.f32.mrb[12].mxu0  ;;  %1764 = vmatprep.mubr.msk.f32.mxu0 %vm795_vm2, %v741_v3 }
 0x13a   :  { %v1898_v11 = vpack.c.bf16 %v730_v7, %v727_v6  ;;  %v601_v13 = vpop.f32.mrb[13].mxu0  ;;  %v600_v15 = vadd.f32 %v599_v9, %v321_v34  ;;  %v2448_v7 = vld [vmem:[%s2480_s6] sm:$0x1]  ;;  %s1997_s6 = smov [#allocation3]  }
 0x13b   :  { %v1896_v12 = vpack.c.bf16 %v731_v8, %v728_v4  ;;  %v602_v16 = vadd.f32 %v601_v13, %v321_v34  ;;  %v2433_v34 = vpop.permute.xlu1 %772  ;;  %s1273_s19 = sshll.u32 %s1997_s6, 4  ;;  %s1274_s19 = int_to_ptr.vmem [resolvable:$true] %s1273_s19 }
 0x13c   :  { %1765 = vmatmul.mubr.msk.f32.gmra.mrb[18].mxu0 %vm795_vm2, %v742_v10  ;;  %v733_v24 = vmax.f32 %v600_v15, 0.0  ;;  %s1968_s20 = scalar_lea.vmem %s1274_s19, 48  ;;  %s1972_s21 = scalar_lea.vmem %s1274_s19, 64 }
 0x13d   :  { %v605_v17 = vpop.f32.mrb[14].mxu0  ;;  %1897 = vmatprep.subr.bf16.mxu1 %v1896_v12  ;;  %1767 = vmatprep.mubr.msk.f32.mxu0 %vm795_vm2, %v743_v14  ;;  %v734_v26 = vmax.f32 %v602_v16, 0.0  ;;  %p1969_p0 = scmp.ne.s32.totalorder %s1274_s19, %s1968_s20  ;;  %p1973_p1 = scmp.lt.s32.totalorder %s1274_s19, %s1274_s19 }
 0x13e   :  { %v606_v19 = vadd.f32 %v605_v17, %v2378_v37  ;;  %v607_v20 = vpop.f32.mrb[15].mxu0  ;;  %1899 = vmatpush1.bf16.msra.mxu1 %v1898_v11  ;;  %p1974_p2 = scmp.lt.s32.totalorder %s1972_s21, %s1968_s20 }
 0x13f   :  { %v608_v23 = vadd.f32 %v607_v20, %v2378_v37  ;;  %v2436_v45 = vpop.permute.xlu1 %782 }
 0x140   :  { %v736_v25 = vmax.f32 %v606_v19, 0.0  ;;  %1768 = vmatmul.mubr.msk.f32.gmra.mrb[20].mxu0 %vm795_vm2, %v744_v18  ;;  %p1975_p3 = por %p1974_p2, %p1973_p1 }
 0x141   :  { %v737_v27 = vmax.f32 %v608_v23, 0.0  ;;  %1770 = vmatprep.mubr.msk.f32.mxu0 %vm795_vm2, %v745_v21 }
 0x142   :  { %v1902_v30 = vpack.c.bf16 %v736_v25, %v733_v24  ;;  %p1976_p4 = pnand %p1975_p3, %p1969_p0 }
 0x143   :  { %v1900_v31 = vpack.c.bf16 %v737_v27, %v734_v26  ;;  %v2439_v54 = vpop.permute.xlu1 %792 }
 0x144   :  { %1771 = vmatmul.mubr.msk.f32.gmra.mrb[22].mxu0 %vm795_vm2, %v746_v29 }
 0x145   :  { %1901 = vmatprep.subr.bf16.mxu1 %v1900_v31  ;;  %1140 = vmatprep.mubr.f32.mxu0 %v1993_v56 }
 0x146   :  { %1903 = vmatpush1.bf16.msra.mxu1 %v1902_v30 }
 0x149   :  { %1345 = vmatmul.mubr.msk.f32.vlgmr.msra.gmra.mrb[8].mxu1 %vm795_vm2, %v2367_v55  ;;  %v1994_v55 = vmov 0.0|0.0  }
 0x14a   :  { %890 = vmatprep.mubr.f32.mxu1 %v1993_v56  ;;  %1936 = vmatprep.subr.bf16.mxu1 %v1994_v55 }
 0x14d   :  { %1346 = vmatmul.mubr.msk.f32.gmra.mrb[10].mxu1 %vm795_vm2, %v740_v60 }
 0x14e   :  { %896 = vmatprep.mubr.f32.mxu1 %v1993_v56 }
 0x151   :  { %1347 = vmatmul.mubr.msk.f32.gmra.mrb[12].mxu1 %vm795_vm2, %v741_v3 }
 0x152   :  { %902 = vmatprep.mubr.f32.mxu1 %v1993_v56 }
 0x155   :  { %1348 = vmatmul.mubr.msk.f32.gmra.mrb[14].mxu1 %vm795_vm2, %v742_v10 }
 0x156   :  { %908 = vmatprep.mubr.f32.mxu1 %v1993_v56 }
 0x159   :  { %1349 = vmatmul.mubr.msk.f32.gmra.mrb[16].mxu1 %vm795_vm2, %v743_v14 }
 0x15a   :  { %914 = vmatprep.mubr.f32.mxu1 %v1993_v56 }
 0x15d   :  { %1350 = vmatmul.mubr.msk.f32.gmra.mrb[18].mxu1 %vm795_vm2, %v744_v18 }
 0x15e   :  { %920 = vmatprep.mubr.f32.mxu1 %v1993_v56 }
 0x161   :  { %1351 = vmatmul.mubr.msk.f32.gmra.mrb[20].mxu1 %vm795_vm2, %v745_v21 }
 0x162   :  { %926 = vmatprep.mubr.f32.mxu1 %v1993_v56 }
 0x165   :  { %1352 = vmatmul.mubr.msk.f32.gmra.mrb[22].mxu1 %vm795_vm2, %v746_v29 }
 0x166   :  { %1789 = vmatprep.mubr.msk.f32.mxu1 %vm1995_vm3, %v1993_v56  ;;  %v778_v56 = vpop.permute.xlu0 %777 }
 0x16a   :  { %v2441_v59 = vpop.permute.xlu0 %787 }
 0x20b   :  { %v1763_v35 = vpop.f32.mrb[16].mxu0 }
 0x20c   :  { %v1005_v37 = vadd.f32 %v1763_v35, %v763_v32  ;;  %v999_v38 = vpop.f32.mrb[17].mxu0 }
 0x20d   :  { %v1000_v39 = vadd.f32 %v999_v38, %v758_v33 }
 0x20e   :  { %v1043_v40 = vmax.f32 %v1005_v37, 0.0 }
 0x20f   :  { %v1040_v41 = vmax.f32 %v1000_v39, 0.0  ;;  %v1766_v42 = vpop.f32.mrb[18].mxu0 }
 0x210   :  { %v1015_v43 = vadd.f32 %v1766_v42, %v2433_v34  ;;  %v1009_v44 = vpop.f32.mrb[19].mxu0 }
 0x211   :  { %v1937_v46 = vpack.c.bf16 %v1043_v40, %v1040_v41  ;;  %v1010_v47 = vadd.f32 %v1009_v44, %v768_v36 }
 0x212   :  { %v1049_v48 = vmax.f32 %v1015_v43, 0.0 }
 0x213   :  { %v1046_v49 = vmax.f32 %v1010_v47, 0.0  ;;  %v1769_v50 = vpop.f32.mrb[20].mxu0  ;;  %1938 = vmatpush3.bf16.msra.mxu1 %v1937_v46 }
 0x214   :  { %v1025_v51 = vadd.f32 %v1769_v50, %v2436_v45  ;;  %v1019_v22 = vpop.f32.mrb[21].mxu0  ;;  %1939 = vmatprep.subr.bf16.mxu1 %v1994_v55 }
 0x215   :  { %v1940_v52 = vpack.c.bf16 %v1049_v48, %v1046_v49  ;;  %v1020_v28 = vadd.f32 %v1019_v22, %v778_v56 }
 0x216   :  { %v1055_v53 = vmax.f32 %v1025_v51, 0.0 }
 0x217   :  { %v1052_v57 = vmax.f32 %v1020_v28, 0.0  ;;  %v1772_v58 = vpop.f32.mrb[22].mxu0  ;;  %1941 = vmatpush3.bf16.msra.mxu1 %v1940_v52 }
 0x218   :  { %v1035_v61 = vadd.f32 %v1772_v58, %v2439_v54  ;;  %v1029_v62 = vpop.f32.mrb[23].mxu0  ;;  %1942 = vmatprep.subr.bf16.mxu1 %v1994_v55 }
 0x219   :  { %v1943_v63 = vpack.c.bf16 %v1055_v53, %v1052_v57  ;;  %v1030_v0 = vadd.f32 %v1029_v62, %v2441_v59 }
 0x21a   :  { %v1061_v60 = vmax.f32 %v1035_v61, 0.0 }
 0x21b   :  { %v1058_v1 = vmax.f32 %v1030_v0, 0.0  ;;  %1944 = vmatpush3.bf16.msra.mxu1 %v1943_v63  ;;  %v1069_v0 = vlaneseq }
 0x21c   :  { %v886_v2 = vpop.f32.mrb[8].mxu1  ;;  %1945 = vmatprep.subr.bf16.mxu1 %v1994_v55 }
 0x21d   :  { %v1946_v3 = vpack.c.bf16 %v1061_v60, %v1058_v1  ;;  %v888_v5 = vpop.f32.mrb[9].mxu1  ;;  %v887_v6 = vadd.f32 %v886_v2, %v758_v33  ;;  %v1070_v60 = vshrl.u32 %v1069_v0, 7  ;;  %v1067_v2 = vpop.permute.xlu0 %1066  ;;  %vm1264_vm4 = vcmp.lt.s32.totalorder %v1069_v0, 384 }
 0x21e   :  { %v889_v4 = vadd.f32 %v888_v5, %v758_v33 }
 0x21f   :  { %1947 = vmatpush3.bf16.msra.mxu1 %v1946_v3  ;;  %v1038_v13 = vmax.f32 %v887_v6, 0.0  ;;  %v1071_v1 = vsub.s32 0, %v1070_v60 }
 0x220   :  { %v892_v8 = vpop.f32.mrb[10].mxu1  ;;  %v1039_v12 = vmax.f32 %v889_v4, 0.0 }
 0x221   :  { %v893_v9 = vadd.f32 %v892_v8, %v763_v32  ;;  %v894_v10 = vpop.f32.mrb[11].mxu1  ;;  %v1072_v3 = vrot.slane %v1067_v2, %v1071_v1 }
 0x222   :  { %v895_v11 = vadd.f32 %v894_v10, %v763_v32  ;;  %1790 = vmatmul.mubr.msk.f32.vlgmr.msra.gmra.mrb[24].mxu1 %vm795_vm2, %v2448_v7 }
 0x223   :  { %v1041_v14 = vmax.f32 %v893_v9, 0.0 }
 0x224   :  { %v1042_v15 = vmax.f32 %v895_v11, 0.0  ;;  %v898_v16 = vpop.f32.mrb[12].mxu1 }
 0x225   :  { %v1922_v17 = vpack.c.bf16 %v1041_v14, %v1038_v13  ;;  %v900_v18 = vpop.f32.mrb[13].mxu1  ;;  %v899_v20 = vadd.f32 %v898_v16, %v768_v36 }
 0x226   :  { %v1920_v19 = vpack.c.bf16 %v1042_v15, %v1039_v12  ;;  %v901_v21 = vadd.f32 %v900_v18, %v768_v36 }
 0x227   :  { %v1044_v27 = vmax.f32 %v899_v20, 0.0 }
 0x228   :  { %v904_v23 = vpop.f32.mrb[14].mxu1  ;;  %1921 = vmatprep.subr.bf16.mxu0 %v1920_v19  ;;  %v1045_v30 = vmax.f32 %v901_v21, 0.0 }
 0x229   :  { %v905_v24 = vadd.f32 %v904_v23, %v2433_v34  ;;  %v906_v25 = vpop.f32.mrb[15].mxu1  ;;  %1923 = vmatpush1.bf16.msra.mxu0 %v1922_v17  ;;  %v1996_v17 = vmov 1966171168  }
 0x22a   :  { %v907_v26 = vadd.f32 %v906_v25, %v2433_v34  ;;  %v1240_v18 = vunpack.c.l.s4 %v1996_v17 }
 0x22b   :  { %v1047_v29 = vmax.f32 %v905_v24, 0.0 }
 0x22c   :  { %v1048_v31 = vmax.f32 %v907_v26, 0.0  ;;  %v910_v55 = vpop.f32.mrb[16].mxu1  ;;  %v1241_v19 = vunpack.c.0.s8 %v1240_v18 }
 0x22d   :  { %v1926_v32 = vpack.c.bf16 %v1047_v29, %v1044_v27  ;;  %v912_v33 = vpop.f32.mrb[17].mxu1  ;;  %v911_v37 = vadd.f32 %v910_v55, %v778_v56 }
 0x22e   :  { %v1924_v35 = vpack.c.bf16 %v1048_v31, %v1045_v30  ;;  %v913_v38 = vadd.f32 %v912_v33, %v778_v56  ;;  %v1244_v23 = vsub.s32 %v1241_v19, %v1070_v60 }
 0x22f   :  { %v1050_v42 = vmax.f32 %v911_v37, 0.0 }
 0x230   :  { %v916_v39 = vpop.f32.mrb[18].mxu1  ;;  %1925 = vmatprep.subr.bf16.mxu0 %v1924_v35  ;;  %v1051_v43 = vmax.f32 %v913_v38, 0.0 }
 0x231   :  { %v917_v36 = vadd.f32 %v916_v39, %v2436_v45  ;;  %v918_v40 = vpop.f32.mrb[19].mxu1  ;;  %1927 = vmatpush1.bf16.msra.mxu0 %v1926_v32 }
 0x232   :  { %v919_v41 = vadd.f32 %v918_v40, %v2436_v45 }
 0x233   :  { %v1053_v34 = vmax.f32 %v917_v36, 0.0 }
 0x234   :  { %v1054_v44 = vmax.f32 %v919_v41, 0.0  ;;  %v922_v46 = vpop.f32.mrb[20].mxu1 }
 0x235   :  { %v1930_v47 = vpack.c.bf16 %v1053_v34, %v1050_v42  ;;  %v924_v48 = vpop.f32.mrb[21].mxu1  ;;  %v923_v50 = vadd.f32 %v922_v46, %v2441_v59 }
 0x236   :  { %v1928_v49 = vpack.c.bf16 %v1054_v44, %v1051_v43  ;;  %v925_v56 = vadd.f32 %v924_v48, %v2441_v59 }
 0x237   :  { %v1056_v28 = vmax.f32 %v923_v50, 0.0 }
 0x238   :  { %v928_v51 = vpop.f32.mrb[22].mxu1  ;;  %1929 = vmatprep.subr.bf16.mxu0 %v1928_v49  ;;  %v1057_v57 = vmax.f32 %v925_v56, 0.0 }
 0x239   :  { %v929_v22 = vadd.f32 %v928_v51, %v2439_v54  ;;  %v930_v52 = vpop.f32.mrb[23].mxu1  ;;  %1931 = vmatpush1.bf16.msra.mxu0 %v1930_v47 }
 0x23a   :  { %v931_v45 = vadd.f32 %v930_v52, %v2439_v54 }
 0x23b   :  { %v1059_v53 = vmax.f32 %v929_v22, 0.0 }
 0x23c   :  { %v1060_v58 = vmax.f32 %v931_v45, 0.0 }
 0x23d   :  { %v1934_v61 = vpack.c.bf16 %v1059_v53, %v1056_v28 }
 0x23e   :  { %v1932_v62 = vpack.c.bf16 %v1060_v58, %v1057_v57 }
 0x240   :  { %1933 = vmatprep.subr.bf16.mxu0 %v1932_v62 }
 0x241   :  { %1935 = vmatpush1.bf16.msra.mxu0 %v1934_v61 }
 0x244   :  { %1361 = vmatmul.mubr.msk.f32.vlgmr.msra.gmra.mrb[24].mxu0 %vm795_vm2, %v2448_v7 }
 0x2f5   :  { %v1213_v59 = vpop.f32.mrb[24].mxu1 }
 0x2f6   :  { %v1791_v63 = vpop.f32.mrb[25].mxu1  ;;  %v1214_v5 = vadd.f32 %v1213_v59, %v1072_v3 }
 0x2f8   :  { %v1365_v54 = vmul.f32 -1.442695, %v1214_v5 }
 0x2fa   :  { %1956 = vpow2.f32 %v1365_v54 }
 0x304   :  { %v1957_v13 = vpop.eup %1956 }
 0x305   :  { %v1228_v7 = vadd.f32 1.0, %v1957_v13 }
 0x317   :  { %v1142_v6 = vpop.f32.mrb[24].mxu0 }
 0x318   :  { %v1143_v4 = vadd.f32 %v1142_v6, %v1072_v3  ;;  %v1144_v8 = vpop.f32.mrb[25].mxu0 }
 0x319   :  { %v1145_v9 = vadd.f32 %v1144_v8, %v1072_v3 }
 0x31a   :  { %v1363_v10 = vmul.f32 -1.442695, %v1143_v4 }
 0x31b   :  { %v1364_v11 = vmul.f32 -1.442695, %v1145_v9 }
 0x31c   :  { %1958 = vpow2.f32 %v1363_v10 }
 0x31d   :  { %1960 = vpow2.f32 %v1364_v11 }
 0x31e   :  { %1962 = vrcp.f32 %v1228_v7 }
 0x326   :  { %v1959_v14 = vpop.eup %1958 }
 0x327   :  { %v1961_v12 = vpop.eup %1960  ;;  %v1226_v15 = vadd.f32 1.0, %v1959_v14 }
 0x328   :  { %v1227_v16 = vadd.f32 1.0, %v1961_v12  ;;  %v1963_v20 = vpop.eup %1962 }
 0x329   :  { %1964 = vrcp.f32 %v1226_v15  ;;  %v1252_v27 = vrot.slane %v1963_v20, %v1244_v23 }
 0x32a   :  { %1966 = vrcp.f32 %v1227_v16 }
 0x333   :  { %v1965_v21 = vpop.eup %1964 }
 0x334   :  { %v1967_v24 = vpop.eup %1966 }
 0x335   :  { %v1238_v25 = vcombine.low %v1965_v21, %v1967_v24 }
 0x337   :  { %v1245_v26 = vrot.slane %v1238_v25, %v1244_v23 }
 0x339   :  { %v1253_v29 = vcombine.low %v1245_v26, %v1252_v27 }
 0x33b   :  { %v1260_v30 = vrot.slane %v1253_v29, %v1244_v23 }
 0x33d   :  { %1266 = vst.msk [vmem:[#allocation3] sm:$0x7] %vm1264_vm4, %v1260_v30 }
 0x33e   :  { %1979 = shalt.err (!%p1976_p4)
}
 0x33f   :  { %s1980_s24 = scalar_lea.hbm %s2482_s8, 48 }
 0x340   :  { %p1981_p5 = scmp.ne.s32.totalorder %s2482_s8, %s1980_s24  ;;  %p1984_p6 = scmp.lt.u32.totalorder %s1980_s24, %s2482_s8 }
 0x342   :  { %p1986_p7 = pnand %p1984_p6, %p1981_p5 }
 0x344   :  { %1989 = shalt.err (!%p1986_p7)
}
 0x345   :  { %1276 = dma.vmem_to_hbm [thread:$0]  %s1274_s19, 48, %s2482_s8, [#allocation4]  }
 0x346   :  { %1990 = dma.done.wait [#allocation4], 48  }
 0x347   :  { %1991 = vsyncadd [#allocation4], 4294967248 }
 0x348   :  { %1280 = vsyncpa [#allocation4], 1 }

</bundles_post_ra>
